<compile_context>
chip_gen: v5e
topology: v5e:2x2
jax: 0.10.0
libtpu: 0.0.40
codegen_flags: <defaults>
</compile_context>

<pallas_src>
import functools

import jax
import jax.numpy as jnp
from jax.experimental import pallas as pl
from jax.experimental.pallas import tpu as pltpu


def _focal_loss_kernel(x_ref, t_ref, alpha_ref, out_ref, *,
                       gamma, hw, tile_cols, use_alpha):
    """One grid step: a (1, C, T) logits tile -> scalar partial loss sum.

    x_ref:     (1, C, T)    logits tile (class axis small/leading, spatial lane-dense)
    t_ref:     (1, 1, T)    int32 target class per spatial column
    alpha_ref: (C, 1)       per-class alpha weights
    out_ref:   (1, 1, 1, 1) f32 partial sum owned by this (n, j) grid step
    """
    x = x_ref[0].astype(jnp.float32)             # (C, T)
    tgt = t_ref[0]                               # (1, T) int32
    C = x.shape[0]

    # log-softmax over the (small, leading) class axis.
    m = jnp.max(x, axis=0, keepdims=True)        # (1, T)
    z = x - m                                    # (C, T)
    ez = jnp.exp(z)
    sum_ez = jnp.sum(ez, axis=0, keepdims=True)  # (1, T)
    lse = jnp.log(sum_ez)                        # (1, T)

    # One-hot select of the target class per column (no per-row dynamic gather).
    class_ids = jax.lax.broadcasted_iota(jnp.int32, (C, 1), 0)   # (C, 1)
    onehot = (class_ids == tgt).astype(jnp.float32)              # (C, T)

    z_t = jnp.sum(z * onehot, axis=0, keepdims=True)             # (1, T)
    logpt = z_t - lse                                            # (1, T)
    pt = jnp.exp(logpt)                                          # (1, T)

    if use_alpha:
        at = jnp.sum(alpha_ref[...].astype(jnp.float32) * onehot,
                     axis=0, keepdims=True)                      # (1, T)
        logpt_w = logpt * at
    else:
        logpt_w = logpt

    # Focal modulation; special-case small integer gammas (avoid pow -> exp+log
    # on the single EUP port).
    if gamma == 0.0:
        focal = jnp.ones_like(pt)
    elif gamma == 1.0:
        focal = 1.0 - pt
    elif gamma == 2.0:
        omp = 1.0 - pt
        focal = omp * omp
    else:
        focal = (1.0 - pt) ** gamma

    loss = -focal * logpt_w                                      # (1, T)

    # Mask the tail columns of the last tile when tile_cols doesn't divide hw.
    if hw % tile_cols != 0:
        j = pl.program_id(1)
        col = jax.lax.broadcasted_iota(jnp.int32, loss.shape, 1) + j * tile_cols
        loss = jnp.where(col < hw, loss, 0.0)

    out_ref[...] = jnp.sum(loss, keepdims=True).reshape(1, 1, 1, 1)


def focal_loss(logits_nchw, target_nhw, *, gamma=2.0, alpha=None,
               reduction="mean", tile_cols=None,
               target_block_bytes=2 * 1024 * 1024):
    """Focal loss matching the PyTorch FocalLoss.forward semantics.

    logits_nchw: (N, C, H, W) float logits (f32 or bf16; no upcast in the wrapper)
    target_nhw:  (N, H, W) integer class indices in [0, C)
    alpha:       None, scalar (binary -> [alpha, 1-alpha]), or length-C array
    """
    N, C, H, W = logits_nchw.shape
    HW = H * W
    M = N * HW

    # Free reshapes only: keep the NCHW memory layout (no transpose / HBM copy).
    x = logits_nchw.reshape(N, C, HW)
    t = target_nhw.reshape(N, 1, HW).astype(jnp.int32)

    use_alpha = alpha is not None
    if alpha is None:
        alpha_vec = jnp.ones((C, 1), dtype=jnp.float32)
    elif isinstance(alpha, (float, int)):
        if C != 2:
            raise ValueError("scalar alpha implies a 2-class problem")
        alpha_vec = jnp.array([[float(alpha)], [1.0 - float(alpha)]],
                              dtype=jnp.float32)
    else:
        alpha_vec = jnp.asarray(alpha, dtype=jnp.float32).reshape(C, 1)

    # Tile the lane-dense spatial axis; target a few MiB of logits per step.
    itemsize = jnp.dtype(x.dtype).itemsize
    if tile_cols is None:
        if HW % 128 == 0:
            t_cols = (target_block_bytes // (C * itemsize)) // 128 * 128
            t_cols = int(max(128, min(t_cols, HW)))
        else:
            t_cols = HW     # block last dim must be a multiple of 128 or the full dim
    else:
        t_cols = int(min(tile_cols, HW))
        if t_cols != HW and t_cols % 128 != 0:
            t_cols = HW

    J = pl.cdiv(HW, t_cols)
    grid = (N, J)

    kernel = functools.partial(_focal_loss_kernel, gamma=float(gamma), hw=HW,
                               tile_cols=t_cols, use_alpha=use_alpha)

    partials = pl.pallas_call(
        kernel,
        out_shape=jax.ShapeDtypeStruct((N, J, 1, 1), jnp.float32),
        grid_spec=pltpu.PrefetchScalarGridSpec(
            num_scalar_prefetch=0,
            grid=grid,
            in_specs=[
                pl.BlockSpec((1, C, t_cols), lambda n, j: (n, 0, j)),
                pl.BlockSpec((1, 1, t_cols), lambda n, j: (n, 0, j)),
                pl.BlockSpec((C, 1), lambda n, j: (0, 0)),
            ],
            out_specs=pl.BlockSpec((1, 1, 1, 1), lambda n, j: (n, j, 0, 0)),
        ),
        compiler_params=pltpu.CompilerParams(
            dimension_semantics=("parallel", "parallel"),
            vmem_limit_bytes=48 * 1024 * 1024),
    )(x, t, alpha_vec)

    total = jnp.sum(partials)
    if reduction == "mean":
        return total / jnp.float32(M)
    elif reduction == "sum":
        return total
    elif reduction == "none":
        # TODO(synk): per-element 'none' reduction would need a lane-dense (N, HW)
        # output spec; only mean/sum are reduced by this kernel.
        raise NotImplementedError("reduction='none' not supported by this kernel")
    else:
        raise RuntimeError


def _focal_loss_ref(logits_nchw, target_nhw, gamma, alpha):
    """Plain-JAX reference mirroring the PyTorch module (mean reduction)."""
    N, C, H, W = logits_nchw.shape
    x = jnp.transpose(logits_nchw, (0, 2, 3, 1)).reshape(-1, C).astype(jnp.float32)
    t = target_nhw.reshape(-1).astype(jnp.int32)
    logp = jax.nn.log_softmax(x, axis=1)
    logpt = jnp.take_along_axis(logp, t[:, None], axis=1)[:, 0]
    pt = jnp.exp(logpt)
    if alpha is not None:
        at = jnp.asarray(alpha, jnp.float32)[t]
        logpt = logpt * at
    loss = -((1.0 - pt) ** gamma) * logpt
    return jnp.mean(loss)


if __name__ == "__main__":
    key = jax.random.PRNGKey(0)
    k_x, k_t = jax.random.split(key)

    N, C, H, W = 2, 4, 16, 16
    gamma = 2.0
    alpha = [0.1, 0.2, 0.3, 0.4]          # per-class weights (list -> torch.Tensor(alpha))

    logits = jax.random.normal(k_x, (N, C, H, W), dtype=jnp.float32)
    target = jax.random.randint(k_t, (N, H, W), 0, C, dtype=jnp.int32)

    out = focal_loss(logits, target, gamma=gamma, alpha=alpha, reduction="mean")
    out = jax.block_until_ready(out)

    ref = _focal_loss_ref(logits, target, gamma, alpha)
    assert jnp.allclose(out, ref, rtol=1e-5, atol=1e-6), (out, ref)

    print("KERNEL_OK")
</pallas_src>

<mosaic_0001>
module attributes {stable_mosaic.version = 11 : i64} {
  func.func @_focal_loss_kernel(%arg0: i32, %arg1: i32, %arg2: memref<1x4x256xf32, #tpu.memory_space<vmem>>, %arg3: memref<1x1x256xi32, #tpu.memory_space<vmem>>, %arg4: memref<4x1xf32, #tpu.memory_space<vmem>>, %arg5: memref<1x1x1x1xf32, #tpu.memory_space<vmem>>) attributes {dimension_semantics = [#tpu.dimension_semantics<parallel>, #tpu.dimension_semantics<parallel>], iteration_bounds = array<i64: 2, 1>, scalar_prefetch = 0 : i64, scratch_operands = 0 : i64, tpu.core_type = #tpu.core_type<tc>, window_params = [{transform_indices = @transform_0, window_bounds = array<i64: 1, 4, 256>}, {transform_indices = @transform_1, window_bounds = array<i64: 1, 1, 256>}, {pipeline_mode = #tpu.pipeline_mode<synchronous>, transform_indices = @transform_2, window_bounds = array<i64: 4, 1>}, {transform_indices = @transform_3, window_bounds = array<i64: 1, 1, 1, 1>}]} {
    %c0 = arith.constant 0 : index
    %c0_0 = arith.constant 0 : index
    %c0_1 = arith.constant 0 : index
    %0 = vector.load %arg2[%c0, %c0_0, %c0_1] : memref<1x4x256xf32, #tpu.memory_space<vmem>>, vector<1x4x256xf32>
    %1 = vector.shape_cast %0 : vector<1x4x256xf32> to vector<4x256xf32>
    %c0_2 = arith.constant 0 : index
    %c0_3 = arith.constant 0 : index
    %c0_4 = arith.constant 0 : index
    %2 = vector.load %arg3[%c0_2, %c0_3, %c0_4] : memref<1x1x256xi32, #tpu.memory_space<vmem>>, vector<1x1x256xi32>
    %3 = vector.shape_cast %2 : vector<1x1x256xi32> to vector<1x256xi32>
    %cst = arith.constant dense<0xFF800000> : vector<256xf32>
    %4 = vector.multi_reduction <maximumf>, %1, %cst [0] : vector<4x256xf32> to vector<256xf32>
    %5 = vector.shape_cast %4 : vector<256xf32> to vector<1x256xf32>
    %6 = vector.broadcast %5 : vector<1x256xf32> to vector<4x256xf32>
    %7 = arith.subf %1, %6 : vector<4x256xf32>
    %8 = math.exp %7 : vector<4x256xf32>
    %cst_5 = arith.constant dense<0.000000e+00> : vector<256xf32>
    %9 = vector.multi_reduction <add>, %8, %cst_5 [0] : vector<4x256xf32> to vector<256xf32>
    %10 = vector.shape_cast %9 : vector<256xf32> to vector<1x256xf32>
    %11 = math.log %10 : vector<1x256xf32>
    %12 = tpu.iota {dimensions = array<i32: 0>} : vector<4x1xi32>
    %13 = vector.broadcast %12 : vector<4x1xi32> to vector<4x256xi32>
    %14 = vector.broadcast %3 : vector<1x256xi32> to vector<4x256xi32>
    %15 = arith.cmpi eq, %13, %14 : vector<4x256xi32>
    %16 = arith.extui %15 : vector<4x256xi1> to vector<4x256xi32>
    %17 = arith.sitofp %16 : vector<4x256xi32> to vector<4x256xf32>
    %18 = arith.mulf %7, %17 : vector<4x256xf32>
    %cst_6 = arith.constant dense<0.000000e+00> : vector<256xf32>
    %19 = vector.multi_reduction <add>, %18, %cst_6 [0] : vector<4x256xf32> to vector<256xf32>
    %20 = vector.shape_cast %19 : vector<256xf32> to vector<1x256xf32>
    %21 = arith.subf %20, %11 : vector<1x256xf32>
    %22 = math.exp %21 : vector<1x256xf32>
    %c0_7 = arith.constant 0 : index
    %c0_8 = arith.constant 0 : index
    %23 = vector.load %arg4[%c0_7, %c0_8] : memref<4x1xf32, #tpu.memory_space<vmem>>, vector<4x1xf32>
    %24 = vector.broadcast %23 : vector<4x1xf32> to vector<4x256xf32>
    %25 = arith.mulf %24, %17 : vector<4x256xf32>
    %cst_9 = arith.constant dense<0.000000e+00> : vector<256xf32>
    %26 = vector.multi_reduction <add>, %25, %cst_9 [0] : vector<4x256xf32> to vector<256xf32>
    %27 = vector.shape_cast %26 : vector<256xf32> to vector<1x256xf32>
    %28 = arith.mulf %21, %27 : vector<1x256xf32>
    %cst_10 = arith.constant 1.000000e+00 : f32
    %29 = vector.broadcast %cst_10 : f32 to vector<1x256xf32>
    %30 = arith.subf %29, %22 : vector<1x256xf32>
    %31 = arith.mulf %30, %30 : vector<1x256xf32>
    %cst_11 = arith.constant 0.000000e+00 : f32
    %32 = vector.broadcast %cst_11 : f32 to vector<1x256xf32>
    %33 = arith.subf %32, %31 : vector<1x256xf32>
    %34 = arith.mulf %33, %28 : vector<1x256xf32>
    %35 = vector.shape_cast %34 : vector<1x256xf32> to vector<1x1x256xf32>
    %cst_12 = arith.constant dense<0.000000e+00> : vector<1xf32>
    %36 = vector.multi_reduction <add>, %35, %cst_12 [1, 2] : vector<1x1x256xf32> to vector<1xf32>
    %37 = vector.shape_cast %36 : vector<1xf32> to vector<1x1x1xf32>
    %38 = vector.extract %37[0, 0, 0] : f32 from vector<1x1x1xf32>
    %39 = vector.broadcast %38 : f32 to vector<1x1xf32>
    %40 = vector.shape_cast %39 : vector<1x1xf32> to vector<1x1x1x1xf32>
    %c0_13 = arith.constant 0 : index
    %c0_14 = arith.constant 0 : index
    %c0_15 = arith.constant 0 : index
    %c0_16 = arith.constant 0 : index
    %41 = vector.load %arg5[%c0_13, %c0_14, %c0_15, %c0_16] : memref<1x1x1x1xf32, #tpu.memory_space<vmem>>, vector<1x1x1x1xf32>
    tpu.vector_store %arg5[%c0_13, %c0_14, %c0_15, %c0_16], %40 {strides = array<i32>} : memref<1x1x1x1xf32, #tpu.memory_space<vmem>>, vector<1x1x1x1xf32>,
    return
  }
  func.func @transform_0(%arg0: i32, %arg1: i32) -> (i32, i32, i32) {
    %c0_i32 = arith.constant 0 : i32
    %c0_i32_0 = arith.constant 0 : i32
    return %arg0, %c0_i32, %arg1 : i32, i32, i32
  }
  func.func @transform_1(%arg0: i32, %arg1: i32) -> (i32, i32, i32) {
    %c0_i32 = arith.constant 0 : i32
    %c0_i32_0 = arith.constant 0 : i32
    return %arg0, %c0_i32, %arg1 : i32, i32, i32
  }
  func.func @transform_2(%arg0: i32, %arg1: i32) -> (i32, i32) {
    %c0_i32 = arith.constant 0 : i32
    %c0_i32_0 = arith.constant 0 : i32
    %c0_i32_1 = arith.constant 0 : i32
    return %c0_i32, %c0_i32_0 : i32, i32
  }
  func.func @transform_3(%arg0: i32, %arg1: i32) -> (i32, i32, i32, i32) {
    %c0_i32 = arith.constant 0 : i32
    %c0_i32_0 = arith.constant 0 : i32
    %c0_i32_1 = arith.constant 0 : i32
    return %arg0, %arg1, %c0_i32, %c0_i32_0 : i32, i32, i32, i32
  }
}

</mosaic_0001>

<bundles_post_ra>
// kernel: tpu_custom_call.1
= control target key start
LH: loop header
LB: loop body
LE: loop exit
PB: predicated region body
PF: predicated region fallthrough
CT: control target
= control target key end

     0   :  { %8 = vsyncpa [#allocation3], 0  ;;  %s782_s0 = inlined_call_operand.hbm [shape: f32[2,4,256], index: 0, kind: input, shape index: {}]   ;;  %s783_s1 = inlined_call_operand.vmem [shape: s32[2,1,256], index: 1, kind: input, shape index: {}]   ;;  %s784_s2 = inlined_call_operand.vmem [shape: f32[4,1], index: 2, kind: input, shape index: {}]   ;;  %s785_s3 = inlined_call_operand.vmem [shape: f32[2,1,1,1], index: 3, kind: output, shape index: {}]  }
   0x1   :  { %10 = vsyncpa [#allocation3 + $0x1], 0  ;;  %s674_s12 = smov 0   ;;  %s676_s13 = smov 0  }
   0x2   :  { %s678_s14 = smov 0   ;;  %s680_s15 = smov 0  }
   0x3   :  { %s682_s16 = smov 0   ;;  %s684_s17 = smov 0  }
   0x4 LB: > { %s485_s18 = sadd.s32 4294967295, %s650_s17   ;;  %s28_s19 = sadd.s32 1, %s646_s16  ;;  %s650_s17 = sphi %s684_s17, %s16_s17   ;;  %s646_s16 = sphi %s682_s16, %s792_s16   ;;  %s642_s15 = sphi %s680_s15, %s791_s15   ;;  %s638_s14 = sphi %s678_s14, %s790_s14   ;;  %s634_s13 = sphi %s676_s13, %s789_s13   ;;  %s630_s12 = sphi %s674_s12, %s788_s12  }
   0x5   : > { %p30_p0 = scmp.ge.s32.totalorder %s28_s19, 2  ;;  %s37_s20 = sadd.s32 1, %s638_s14 }
   0x6   : > { %p44_p1 = scmp.ne.s32.totalorder %s638_s14, %s634_s13  ;;  %p45_p2 = scmp.eq.s32.totalorder %s650_s17, 0 }
   0x7   : > { %s794_s19 = smov (%p30_p0, %s28_s19), 0  ;;  %p50_p4 = scmp.ne.s32.totalorder %s634_s13, %s630_s12 }
   0x8   : > { %p710_p3 = por %p45_p2, %p44_p1  ;;  %s32_s22 = ssub.s32 %s646_s16, %s794_s19 }
   0x9   : > { %p51_p5 = scmp.eq.s32.totalorder %s485_s18, 0  ;;  %p35_p6 = scmp.eq.s32.totalorder %s32_s22, 0 }
   0xa   : > { %p508_p8 = scmp.lt.s32.totalorder %s650_s17, 2  ;;  %s154_s25 = sand.u32 1, %s638_s14  }
   0xb   : > { %p717_p7 = por %p51_p5, %p50_p4  ;;  %s499_s26 = sshll.u32 %s646_s16, 3 }
   0xc   : > { %s723_s24 = scalar_select %p35_p6, %s638_s14, %s37_s20  }
   0xd   : > { %s489_s27 = sshll.u32 %s154_s25, 3  ;;  %s165_s30 = scalar_lea.hbm %s782_s0, %s499_s26 }
   0xe   : > { %s167_s4 = sshll.u32 %s165_s30, 4  ;;  %s158_s5 = scalar_lea.vmem [#allocation2], %s489_s27  ;;  %s168_s4 = int_to_ptr.hbm [resolvable:$true] %s167_s4 }
   0xf   : > { %s169_s6 = sshll.u32 %s158_s5, 4  ;;  %p505_p9 = pnand %p508_p8, %p710_p3  ;;  %s170_s6 = int_to_ptr.vmem [resolvable:$true] %s169_s6 }
  0x10   : > { %p492_p10 = scmp.ge.s32.totalorder %s650_s17, 1  ;;  %p186_p11 = scmp.lt.s32.totalorder %s650_s17, 3 }
  0x11   : > { %s155_s7 = scalar_lea.sflag [#allocation3], %s154_s25 }
  0x12   : > { %507 = dma.hbm_to_vmem [thread:$0]  (!%p505_p9), %s168_s4, 128, %s170_s6, %s155_s7  }
  0x13   : > { %p187_p12 = pnand %p492_p10, %p186_p11 }
  0x14   : > { %s192_s8 = sand.u32 (!%p187_p12), 1, %s634_s13  }
  0x15   : > { %190 = sbr.rel (%p187_p12) target bundleno = 346 (0x15a), region = 32  ;;  %s493_s9 = sshll.u32 (!%p187_p12), %s192_s8, 3 }
  0x16   : > { %s193_s10 = scalar_lea.sflag (!%p187_p12), [#allocation3], %s192_s8  ;;  %s196_s11 = scalar_lea.vmem (!%p187_p12), [#allocation2], %s493_s9 }
  0x1a   : > { %625 = dma.done.wait (%p717_p7), %s193_s10, 128  }
  0x1b   : > { %627 = vsyncadd (%p717_p7), %s193_s10, 4294967168  ;;  %v652_v0 = vmov 0   ;;  %v342_v1 = vld [vmem:[%s784_s2] sm:$0xf]  ;;  %v245_v2 = vld [vmem:[%s196_s11] sm:$0xff]  ;;  %vm253_vm0 = vcmask 1043456   ;;  %v300_v23 = vlaneseq }
  0x1c   : > { %559 = vset.pattern.permute.xlu0 %v652_v0  ;;  %248 = vst [vmem:[#allocation1] ss:$2 sm:$0xff] %v245_v2  ;;  %p231_p13 = scmp.lt.s32.totalorder %s642_s15, 1  ;;  %v653_v29 = vmov 0.0   ;;  %vm374_vm3 = vcmask 1040384   ;;  %vm388_vm4 = vcmask 0  }
  0x1d   : > { %345 = vperm.xlu0 %559, %v342_v1   ;;  %v301_v24 = vshrl.u32 %v300_v23, 7 }
  0x1e   : > { %s796_s15 = smov (!%p231_p13, %s642_s15), 1 }
  0x1f   : > { %s494_s20 = sshll.u32 %s796_s15, 1  ;;  %s244_s27 = scalar_lea.vmem %s785_s3, %s796_s15 }
  0x20   : > { %s237_s23 = scalar_lea.vmem %s783_s1, %s494_s20 }
  0x21   : > { %v246_v26 = vld [vmem:[%s237_s23] sm:$0x3] }
  0x22   : > { %v303_v27 = vperm.slane %v246_v26, 1  ;;  %v302_v28 = vperm.slane %v246_v26, 0 }
  0x23   : > { %v250_v3 = vld.sshfl [vmem:[#allocation1 + $0x8] sm:$0xff pattern:$0x75316420]  ;;  %v249_v5 = vld.sshfl [vmem:[#allocation1] sm:$0xff pattern:$0x75316420] }
  0x24   : > { %v261_v4 = vsel %vm253_vm0, %v250_v3, -inf  ;;  %v254_v7 = vsel %vm253_vm0, %v249_v5, -inf  ;;  %vm305_vm1 = vcmp.eq.s32.totalorder %v301_v24, %v303_v27  ;;  %vm304_vm2 = vcmp.eq.s32.totalorder %v301_v24, %v302_v28 }
  0x25   : > { %v262_v6 = vrot.slane %v261_v4, 4  ;;  %v255_v8 = vrot.slane %v254_v7, 4  ;;  %v496_v30 = vsel %vm305_vm1, 1.0, %v653_v29  ;;  %v495_v32 = vsel %vm304_vm2, 1.0, %v653_v29 }
  0x26   : > { %v312_v31 = vrot.slane %v496_v30, 4 }
  0x27   : > { %v263_v9 = vmax.f32 %v261_v4, %v262_v6  ;;  %v256_v10 = vmax.f32 %v254_v7, %v255_v8 }
  0x28   : > { %v313_v33 = vsel %vm253_vm0, %v495_v32, %v312_v31 }
  0x29   : > { %v264_v11 = vrot.slane %v263_v9, 2  ;;  %v257_v12 = vrot.slane %v256_v10, 2 }
  0x2b   : > { %v265_v13 = vmax.f32 %v263_v9, %v264_v11  ;;  %v258_v14 = vmax.f32 %v256_v10, %v257_v12 }
  0x2d   : > { %v266_v15 = vrot.slane %v265_v13, 1  ;;  %v259_v16 = vrot.slane %v258_v14, 1 }
  0x2f   : > { %v267_v17 = vmax.f32 %v265_v13, %v266_v15  ;;  %v260_v18 = vmax.f32 %v258_v14, %v259_v16 }
  0x31   : > { %v270_v19 = vrot.slane %v267_v17, 4 }
  0x33   : > { %v271_v20 = vsel %vm253_vm0, %v260_v18, %v270_v19 }
  0x34   : > { %v273_v21 = vsub.f32 %v245_v2, %v271_v20 }
  0x36   : > { %v274_v22 = vmul.f32 1.442695, %v273_v21  ;;  %v315_v34 = vmul.f32 %v313_v33, %v273_v21 }
  0x38   : > { %560 = vpow2.f32 %v274_v22 }
  0x3e   : > { %v561_v25 = vpop.eup %560 }
  0x3f   : > { %277 = vst [vmem:[#allocation1] ss:$2 sm:$0xff] %v561_v25 }
  0x46   : > { %v278_v35 = vld.sshfl [vmem:[#allocation1] sm:$0xff pattern:$0x75316420]  ;;  %v279_v36 = vld.sshfl [vmem:[#allocation1 + $0x8] sm:$0xff pattern:$0x75316420] }
  0x47   : > { %v282_v37 = vsel %vm253_vm0, %v278_v35, 0.0  ;;  %317 = vst [vmem:[#allocation1] ss:$2 sm:$0xff] %v315_v34  ;;  %v289_v38 = vsel %vm253_vm0, %v279_v36, 0.0 }
  0x48   : > { %v283_v39 = vrot.slane %v282_v37, 4  ;;  %v290_v40 = vrot.slane %v289_v38, 4 }
  0x4a   : > { %v284_v41 = vadd.f32 %v283_v39, %v282_v37  ;;  %v291_v42 = vadd.f32 %v290_v40, %v289_v38 }
  0x4c   : > { %v285_v44 = vrot.slane %v284_v41, 2  ;;  %v292_v46 = vrot.slane %v291_v42, 2 }
  0x4e   : > { %v318_v43 = vld.sshfl [vmem:[#allocation1] sm:$0xff pattern:$0x75316420]  ;;  %v319_v45 = vld.sshfl [vmem:[#allocation1 + $0x8] sm:$0xff pattern:$0x75316420]  ;;  %v286_v49 = vadd.f32 %v285_v44, %v284_v41  ;;  %v293_v50 = vadd.f32 %v292_v46, %v291_v42 }
  0x4f   : > { %v322_v47 = vsel %vm253_vm0, %v318_v43, 0.0  ;;  %v329_v48 = vsel %vm253_vm0, %v319_v45, 0.0 }
  0x50   : > { %v323_v51 = vrot.slane %v322_v47, 4  ;;  %v330_v52 = vrot.slane %v329_v48, 4  ;;  %v287_v53 = vrot.slane %v286_v49, 1  ;;  %v294_v54 = vrot.slane %v293_v50, 1 }
  0x52   : > { %v324_v55 = vadd.f32 %v323_v51, %v322_v47  ;;  %v331_v56 = vadd.f32 %v330_v52, %v329_v48  ;;  %v288_v57 = vadd.f32 %v287_v53, %v286_v49  ;;  %v295_v58 = vadd.f32 %v294_v54, %v293_v50 }
  0x54   : > { %v325_v59 = vrot.slane %v324_v55, 2  ;;  %v332_v60 = vrot.slane %v331_v56, 2  ;;  %562 = vlog2.f32 %v288_v57 }
  0x55   : > { %564 = vlog2.f32 %v295_v58 }
  0x56   : > { %v326_v61 = vadd.f32 %v325_v59, %v324_v55  ;;  %v333_v62 = vadd.f32 %v332_v60, %v331_v56 }
  0x58   : > { %v327_v63 = vrot.slane %v326_v61, 1  ;;  %v334_v1 = vrot.slane %v333_v62, 1 }
  0x5a   : > { %v563_v0 = vpop.eup %562  ;;  %v328_v4 = vadd.f32 %v327_v63, %v326_v61  ;;  %v335_v6 = vadd.f32 %v334_v1, %v333_v62 }
  0x5b   : > { %v565_v2 = vpop.eup %564  ;;  %v297_v3 = vmul.f32 0.6931472, %v563_v0 }
  0x5c   : > { %v299_v5 = vmul.f32 0.6931472, %v565_v2 }
  0x5d   : > { %v336_v7 = vsub.f32 %v328_v4, %v297_v3 }
  0x5e   : > { %v337_v8 = vsub.f32 %v335_v6, %v299_v5 }
  0x5f   : > { %v338_v9 = vmul.f32 1.442695, %v336_v7 }
  0x60   : > { %v340_v10 = vmul.f32 1.442695, %v337_v8 }
  0x61   : > { %566 = vpow2.f32 %v338_v9 }
  0x62   : > { %568 = vpow2.f32 %v340_v10 }
  0x67   : > { %v567_v14 = vpop.eup %566 }
  0x68   : > { %v569_v15 = vpop.eup %568  ;;  %v366_v22 = vsub.f32 1.0, %v567_v14 }
  0x69   : > { %v367_v23 = vsub.f32 1.0, %v569_v15 }
  0x6a   : > { %v368_v28 = vmul.f32 %v366_v22, %v366_v22 }
  0x6b   : > { %v369_v29 = vmul.f32 %v367_v23, %v367_v23 }
  0x6c   : > { %v370_v34 = vsub.f32 0.0, %v368_v28 }
  0x6d   : > { %v371_v35 = vsub.f32 0.0, %v369_v29 }
  0x8f   : > { %v346_v11 = vpop.permute.xlu0 %345 }
  0x90   : > { %v348_v12 = vmul.f32 %v495_v32, %v346_v11  ;;  %v349_v13 = vmul.f32 %v496_v30, %v346_v11 }
  0x92   : > { %v350_v16 = vsel %vm253_vm0, %v348_v12, 0.0  ;;  %v357_v17 = vsel %vm253_vm0, %v349_v13, 0.0 }
  0x93   : > { %v351_v18 = vrot.slane %v350_v16, 4  ;;  %v358_v19 = vrot.slane %v357_v17, 4 }
  0x95   : > { %v352_v20 = vadd.f32 %v351_v18, %v350_v16  ;;  %v359_v21 = vadd.f32 %v358_v19, %v357_v17 }
  0x97   : > { %v353_v24 = vrot.slane %v352_v20, 2  ;;  %v360_v25 = vrot.slane %v359_v21, 2 }
  0x99   : > { %v354_v26 = vadd.f32 %v353_v24, %v352_v20  ;;  %v361_v27 = vadd.f32 %v360_v25, %v359_v21 }
  0x9b   : > { %v355_v31 = vrot.slane %v354_v26, 1  ;;  %v362_v30 = vrot.slane %v361_v27, 1 }
  0x9d   : > { %v356_v32 = vadd.f32 %v355_v31, %v354_v26  ;;  %v363_v33 = vadd.f32 %v362_v30, %v361_v27 }
  0x9f   : > { %v364_v36 = vmul.f32 %v356_v32, %v336_v7  ;;  %v365_v37 = vmul.f32 %v363_v33, %v337_v8 }
  0xa1   : > { %v372_v38 = vmul.f32 %v370_v34, %v364_v36  ;;  %v373_v39 = vmul.f32 %v371_v35, %v365_v37 }
  0xa3   : > { %v375_v40 = vsel %vm374_vm3, %v372_v38, 0.0  ;;  %v376_v41 = vsel %vm374_vm3, %v373_v39, 0.0 }
  0xa4   : > { %v377_v42 = vadd.f32 %v376_v41, %v375_v40 }
  0xa6   : > { %378 = vadd.xlane.f32.xlu0 %v377_v42 }
 0x119   : > { %v379_v43 = vpop.xlane.xlu0 %378 }
 0x11a   : > { %v380_v44 = vrot.slane %v379_v43, 4 }
 0x11c   : > { %v381_v45 = vadd.f32 %v380_v44, %v379_v43 }
 0x11e   : > { %v382_v46 = vrot.slane %v381_v45, 2 }
 0x120   : > { %v383_v47 = vadd.f32 %v382_v46, %v381_v45 }
 0x122   : > { %v384_v48 = vrot.slane %v383_v47, 1 }
 0x124   : > { %v385_v49 = vadd.f32 %v384_v48, %v383_v47 }
 0x126   : > { %500 = vpush %v385_v49 }
 0x157   : > { %s501_s28 = spop %500 }
 0x158   : > { %v387_v50 = vstv %s501_s28 }
 0x159   : > { %389 = vst.msk [vmem:[%s244_s27] sm:$0x1] %vm388_vm4, %v387_v50 }
 0x15a PF: > { %s16_s17 = sadd.s32 1, %s650_s17   ;;  %s788_s12 = smov %s634_s13 }
 0x15b   : > { %p13_p0 = scmp.ge.s32.totalorder %s16_s17, 4   ;;  %s789_s13 = smov %s638_s14 }
 0x15c   : > { %s790_s14 = smov %s723_s24  ;;  %s791_s15 = smov %s646_s16 }
 0x15d   : > { %s792_s16 = smov %s794_s19  ;;  %15 = sbr.rel (!%p13_p0) target bundleno = 4 (0x4), region = 75 }
 0x162   :  { %413 = vsyncpa [#allocation3], 1 }
 0x163   :  { %415 = vsyncpa [#allocation3 + $0x1], 1 }

</bundles_post_ra>
